<compile_context>
chip_gen: v7x
topology: tpu7x:2x2x1
jax: 0.10.0
libtpu: 0.0.40
codegen_flags: <defaults>
</compile_context>

<pallas_src>
import functools

import jax
import jax.numpy as jnp
from jax.experimental import pallas as pl
from jax.experimental.pallas import tpu as pltpu


def _round_up(x, m):
    return ((x + m - 1) // m) * m


def _make_mlp_kernel(num_layers):
    """Build a kernel applying `num_layers` x (Linear + Tanh) on one batch tile."""

    def kernel(latent_ref, *refs):
        # refs = (w0, b0, w1, b1, ..., w_{L-1}, b_{L-1}, out_ref)
        out_ref = refs[-1]
        x = latent_ref[...]  # native dtype straight to the MXU
        for layer in range(num_layers):
            w = refs[2 * layer][...]
            b = refs[2 * layer + 1][...]
            acc = jnp.dot(x, w, preferred_element_type=jnp.float32)
            acc = acc + b.astype(jnp.float32)
            # tanh on EUP in f32, then back to param dtype for the next matmul.
            x = jnp.tanh(acc).astype(w.dtype)
        out_ref[...] = x.astype(out_ref.dtype)

    return kernel


def init_mlp_decoder_params(key, input_size, input_length, latent_size,
                            hidden_layers=(32,), dtype=jnp.float32):
    """Deterministic parameter init mirroring the nn.Linear shapes in __init__."""
    dims = [latent_size] + list(hidden_layers) + [input_size * input_length]
    params = []
    for i in range(len(dims) - 1):
        key, kw, kb = jax.random.split(key, 3)
        fan_in, fan_out = dims[i], dims[i + 1]
        bound = 1.0 / jnp.sqrt(jnp.asarray(fan_in, jnp.float32))
        # stored as (in, out) -> kernel computes x @ w + b
        w = jax.random.uniform(kw, (fan_in, fan_out), dtype, -bound, bound)
        b = jax.random.uniform(kb, (1, fan_out), dtype, -bound, bound)
        params.append((w, b))
    return params


@functools.partial(jax.jit, static_argnames=("input_size", "input_length"))
def mlp_decoder_forward(latent, params, *, input_size, input_length):
    """Pallas-backed forward: Y = unflatten(mlp(latent))."""
    batch, latent_size = latent.shape
    out_dim = input_size * input_length
    num_layers = len(params)

    # ---- batch tiling: TB multiple of 8, up to 256 (2x256 MXU on v6e/v7x) ----
    TB = min(256, _round_up(batch, 8))
    padded_batch = _round_up(batch, TB)

    # ---- lane-dense padding: every feature dim -> multiple of 128 -----------
    def pad2(x, rows, cols):
        pr, pc = rows - x.shape[0], cols - x.shape[1]
        if pr or pc:
            x = jnp.pad(x, ((0, pr), (0, pc)))
        return x

    k_pad = _round_up(latent_size, 128)
    latent_p = pad2(latent, padded_batch, k_pad)

    padded_params = []
    in_pad = k_pad
    for (w, b) in params:
        o_pad = _round_up(w.shape[1], 128)
        padded_params.append((pad2(w, in_pad, o_pad), pad2(b, 1, o_pad)))
        in_pad = o_pad
    out_pad = in_pad  # padded width of the final layer

    flat_params = []
    for (w_p, b_p) in padded_params:
        flat_params.extend([w_p, b_p])

    # ---- BlockSpecs ----------------------------------------------------------
    lat_spec = pl.BlockSpec((TB, k_pad), lambda i: (i, 0))
    param_specs = []
    for (w_p, b_p) in padded_params:
        # Constant block index across the batch axis => fetched once, no
        # redundant HBM->VMEM DMA per batch tile.
        param_specs.append(pl.BlockSpec(w_p.shape, lambda i: (0, 0)))
        param_specs.append(pl.BlockSpec(b_p.shape, lambda i: (0, 0)))
    out_spec = pl.BlockSpec((TB, out_pad), lambda i: (i, 0))

    # ---- Cost estimate for the XLA scheduler ---------------------------------
    itemsize = jnp.dtype(latent.dtype).itemsize
    flops = 0
    transcendentals = 0
    bytes_accessed = padded_batch * k_pad * itemsize
    for (w_p, b_p) in padded_params:
        flops += 2 * padded_batch * w_p.shape[0] * w_p.shape[1]
        transcendentals += padded_batch * w_p.shape[1]
        bytes_accessed += (w_p.size + b_p.size) * jnp.dtype(w_p.dtype).itemsize
    bytes_accessed += padded_batch * out_pad * itemsize

    y_pad = pl.pallas_call(
        _make_mlp_kernel(num_layers),
        out_shape=jax.ShapeDtypeStruct((padded_batch, out_pad), latent.dtype),
        grid_spec=pl.GridSpec(
            grid=(padded_batch // TB,),
            in_specs=[lat_spec] + param_specs,
            out_specs=out_spec,
        ),
        compiler_params=pltpu.CompilerParams(
            # batch tiles are independent -> shard across both TCs on v7x.
            dimension_semantics=("parallel",),
        ),
        cost_estimate=pl.CostEstimate(
            flops=flops,
            transcendentals=transcendentals,
            bytes_accessed=bytes_accessed,
        ),
    )(latent_p, *flat_params)

    # Slice off batch / lane padding, then nn.Unflatten(1, (L, C)) == reshape.
    y = y_pad[:batch, :out_dim]
    return y.reshape(batch, input_length, input_size)


def _reference_forward(latent, params, input_size, input_length):
    """Pure-JAX reference (mirrors the PyTorch nn.Sequential exactly)."""
    x = latent.astype(jnp.float32)
    for (w, b) in params:
        x = jnp.tanh(x @ w.astype(jnp.float32) + b.astype(jnp.float32))
    return x.reshape(latent.shape[0], input_length, input_size).astype(latent.dtype)


if __name__ == "__main__":
    # Small shapes consistent with the module's forward.
    # (At toy sizes fixed kernel overhead dominates; the tiling pays off at
    #  batch >= 128 and feature dims >= 128.)
    batch = 2
    latent_size = 8
    hidden_layers = (32, 32)
    input_size = 4
    input_length = 8

    key = jax.random.PRNGKey(0)
    k_lat, k_par = jax.random.split(key)

    latent = jax.random.normal(k_lat, (batch, latent_size), jnp.float32)
    params = init_mlp_decoder_params(
        k_par, input_size, input_length, latent_size, hidden_layers
    )

    y = mlp_decoder_forward(
        latent, params, input_size=input_size, input_length=input_length
    )
    y = jax.block_until_ready(y)

    y_ref = _reference_forward(latent, params, input_size, input_length)
    assert y.shape == (batch, input_length, input_size)
    assert jnp.allclose(y, y_ref, atol=1e-5, rtol=1e-5)

    print("KERNEL_OK")
</pallas_src>

<mosaic_0001>
module attributes {stable_mosaic.version = 11 : i64} {
  func.func @kernel(%arg0: i32, %arg1: memref<8x128xf32, #tpu.memory_space<vmem>>, %arg2: memref<128x128xf32, #tpu.memory_space<vmem>>, %arg3: memref<1x128xf32, #tpu.memory_space<vmem>>, %arg4: memref<128x128xf32, #tpu.memory_space<vmem>>, %arg5: memref<1x128xf32, #tpu.memory_space<vmem>>, %arg6: memref<128x128xf32, #tpu.memory_space<vmem>>, %arg7: memref<1x128xf32, #tpu.memory_space<vmem>>, %arg8: memref<8x128xf32, #tpu.memory_space<vmem>>) attributes {dimension_semantics = [#tpu.dimension_semantics<parallel>], iteration_bounds = array<i64: 1>, scalar_prefetch = 0 : i64, scratch_operands = 0 : i64, tpu.core_type = #tpu.core_type<tc>, window_params = [{transform_indices = @transform_0, window_bounds = array<i64: 8, 128>}, {pipeline_mode = #tpu.pipeline_mode<synchronous>, transform_indices = @transform_1, window_bounds = array<i64: 128, 128>}, {pipeline_mode = #tpu.pipeline_mode<synchronous>, transform_indices = @transform_2, window_bounds = array<i64: 1, 128>}, {pipeline_mode = #tpu.pipeline_mode<synchronous>, transform_indices = @transform_3, window_bounds = array<i64: 128, 128>}, {pipeline_mode = #tpu.pipeline_mode<synchronous>, transform_indices = @transform_4, window_bounds = array<i64: 1, 128>}, {pipeline_mode = #tpu.pipeline_mode<synchronous>, transform_indices = @transform_5, window_bounds = array<i64: 128, 128>}, {pipeline_mode = #tpu.pipeline_mode<synchronous>, transform_indices = @transform_6, window_bounds = array<i64: 1, 128>}, {transform_indices = @transform_7, window_bounds = array<i64: 8, 128>}]} {
    %c0 = arith.constant 0 : index
    %c0_0 = arith.constant 0 : index
    %0 = vector.load %arg1[%c0, %c0_0] : memref<8x128xf32, #tpu.memory_space<vmem>>, vector<8x128xf32>
    %c0_1 = arith.constant 0 : index
    %c0_2 = arith.constant 0 : index
    %1 = vector.load %arg2[%c0_1, %c0_2] : memref<128x128xf32, #tpu.memory_space<vmem>>, vector<128x128xf32>
    %c0_3 = arith.constant 0 : index
    %c0_4 = arith.constant 0 : index
    %2 = vector.load %arg3[%c0_3, %c0_4] : memref<1x128xf32, #tpu.memory_space<vmem>>, vector<1x128xf32>
    %cst = arith.constant dense<0.000000e+00> : vector<8x128xf32>
    %3 = tpu.matmul %0, %1, %cst {dimension_numbers = #tpu.dot_dimension_numbers<[1], [0], [0], [1], [0, 0, 1, 1], [], []>} : vector<8x128xf32>, vector<128x128xf32>, vector<8x128xf32> -> vector<8x128xf32>
    %4 = vector.broadcast %2 : vector<1x128xf32> to vector<8x128xf32>
    %5 = arith.addf %3, %4 : vector<8x128xf32>
    %6 = math.tanh %5 : vector<8x128xf32>
    %c0_5 = arith.constant 0 : index
    %c0_6 = arith.constant 0 : index
    %7 = vector.load %arg4[%c0_5, %c0_6] : memref<128x128xf32, #tpu.memory_space<vmem>>, vector<128x128xf32>
    %c0_7 = arith.constant 0 : index
    %c0_8 = arith.constant 0 : index
    %8 = vector.load %arg5[%c0_7, %c0_8] : memref<1x128xf32, #tpu.memory_space<vmem>>, vector<1x128xf32>
    %cst_9 = arith.constant dense<0.000000e+00> : vector<8x128xf32>
    %9 = tpu.matmul %6, %7, %cst_9 {dimension_numbers = #tpu.dot_dimension_numbers<[1], [0], [0], [1], [0, 0, 1, 1], [], []>} : vector<8x128xf32>, vector<128x128xf32>, vector<8x128xf32> -> vector<8x128xf32>
    %10 = vector.broadcast %8 : vector<1x128xf32> to vector<8x128xf32>
    %11 = arith.addf %9, %10 : vector<8x128xf32>
    %12 = math.tanh %11 : vector<8x128xf32>
    %c0_10 = arith.constant 0 : index
    %c0_11 = arith.constant 0 : index
    %13 = vector.load %arg6[%c0_10, %c0_11] : memref<128x128xf32, #tpu.memory_space<vmem>>, vector<128x128xf32>
    %c0_12 = arith.constant 0 : index
    %c0_13 = arith.constant 0 : index
    %14 = vector.load %arg7[%c0_12, %c0_13] : memref<1x128xf32, #tpu.memory_space<vmem>>, vector<1x128xf32>
    %cst_14 = arith.constant dense<0.000000e+00> : vector<8x128xf32>
    %15 = tpu.matmul %12, %13, %cst_14 {dimension_numbers = #tpu.dot_dimension_numbers<[1], [0], [0], [1], [0, 0, 1, 1], [], []>} : vector<8x128xf32>, vector<128x128xf32>, vector<8x128xf32> -> vector<8x128xf32>
    %16 = vector.broadcast %14 : vector<1x128xf32> to vector<8x128xf32>
    %17 = arith.addf %15, %16 : vector<8x128xf32>
    %18 = math.tanh %17 : vector<8x128xf32>
    %c0_15 = arith.constant 0 : index
    %c0_16 = arith.constant 0 : index
    %19 = vector.load %arg8[%c0_15, %c0_16] : memref<8x128xf32, #tpu.memory_space<vmem>>, vector<8x128xf32>
    tpu.vector_store %arg8[%c0_15, %c0_16], %18 {strides = array<i32>} : memref<8x128xf32, #tpu.memory_space<vmem>>, vector<8x128xf32>,
    return
  }
  func.func @transform_0(%arg0: i32) -> (i32, i32) {
    %c0_i32 = arith.constant 0 : i32
    %c0_i32_0 = arith.constant 0 : i32
    return %arg0, %c0_i32 : i32, i32
  }
  func.func @transform_1(%arg0: i32) -> (i32, i32) {
    %c0_i32 = arith.constant 0 : i32
    %c0_i32_0 = arith.constant 0 : i32
    %c0_i32_1 = arith.constant 0 : i32
    return %c0_i32, %c0_i32_0 : i32, i32
  }
  func.func @transform_2(%arg0: i32) -> (i32, i32) {
    %c0_i32 = arith.constant 0 : i32
    %c0_i32_0 = arith.constant 0 : i32
    %c0_i32_1 = arith.constant 0 : i32
    return %c0_i32, %c0_i32_0 : i32, i32
  }
  func.func @transform_3(%arg0: i32) -> (i32, i32) {
    %c0_i32 = arith.constant 0 : i32
    %c0_i32_0 = arith.constant 0 : i32
    %c0_i32_1 = arith.constant 0 : i32
    return %c0_i32, %c0_i32_0 : i32, i32
  }
  func.func @transform_4(%arg0: i32) -> (i32, i32) {
    %c0_i32 = arith.constant 0 : i32
    %c0_i32_0 = arith.constant 0 : i32
    %c0_i32_1 = arith.constant 0 : i32
    return %c0_i32, %c0_i32_0 : i32, i32
  }
  func.func @transform_5(%arg0: i32) -> (i32, i32) {
    %c0_i32 = arith.constant 0 : i32
    %c0_i32_0 = arith.constant 0 : i32
    %c0_i32_1 = arith.constant 0 : i32
    return %c0_i32, %c0_i32_0 : i32, i32
  }
  func.func @transform_6(%arg0: i32) -> (i32, i32) {
    %c0_i32 = arith.constant 0 : i32
    %c0_i32_0 = arith.constant 0 : i32
    %c0_i32_1 = arith.constant 0 : i32
    return %c0_i32, %c0_i32_0 : i32, i32
  }
  func.func @transform_7(%arg0: i32) -> (i32, i32) {
    %c0_i32 = arith.constant 0 : i32
    %c0_i32_0 = arith.constant 0 : i32
    return %arg0, %c0_i32 : i32, i32
  }
}

</mosaic_0001>

<bundles_post_ra>
// kernel: mlp_decoder_forward.1
= control target key start
LH: loop header
LB: loop body
LE: loop exit
PB: predicated region body
PF: predicated region fallthrough
CT: control target
= control target key end

     0   :  { %v554_v0 = vmov 0.0|0.0   ;;  %vm555_vm0 = vmmov 0   ;;  %v556_v4 = vmov 0.0   ;;  %s786_s1 = inlined_call_operand.vmem [shape: f32[128,128], index: 1, kind: input, shape index: {}]   ;;  %s787_s3 = inlined_call_operand.vmem [shape: f32[128,128], index: 3, kind: input, shape index: {}]   ;;  %s788_s0 = inlined_call_operand.vmem [shape: f32[8,128], index: 0, kind: input, shape index: {}]   ;;  %s789_s5 = inlined_call_operand.vmem [shape: f32[128,128], index: 5, kind: input, shape index: {}]   ;;  %s790_s2 = inlined_call_operand.vmem [shape: f32[1,128], index: 2, kind: input, shape index: {}]   ;;  %s791_s4 = inlined_call_operand.vmem [shape: f32[1,128], index: 4, kind: input, shape index: {}]   ;;  %s792_s6 = inlined_call_operand.vmem [shape: f32[1,128], index: 6, kind: input, shape index: {}]   ;;  %s793_s7 = inlined_call_operand.vmem [shape: f32[8,128], index: 7, kind: output, shape index: {}]  }
   0x1   :  { %473 = vmatprep.subr.bf16.mxu0 %v554_v0  ;;  %v27_v1 = vld [vmem:[%s786_s1] sm:$0xff]  ;;  %v28_v2 = vld [vmem:[%s786_s1 + $0x8] sm:$0xff]  ;;  %v29_v3 = vld [vmem:[%s786_s1 + $0x10] sm:$0xff]  ;;  %400 = vmatprep.mubr.msk.f32.mxu0 %vm555_vm0, %v556_v4 }
   0x2   :  { %v474_v5 = vpack.c.bf16 %v28_v2, %v27_v1  ;;  %v30_v6 = vld [vmem:[%s786_s1 + $0x18] sm:$0xff]  ;;  %497 = vmatprep.subr.bf16.mxu1 %v554_v0  ;;  %435 = vmatprep.mubr.msk.f32.mxu1 %vm555_vm0, %v556_v4  ;;  %v31_v8 = vld [vmem:[%s786_s1 + $0x20] sm:$0xff]  ;;  %v32_v9 = vld [vmem:[%s786_s1 + $0x28] sm:$0xff] }
   0x3   :  { %v477_v7 = vpack.c.bf16 %v30_v6, %v29_v3  ;;  %v121_v10 = vld [vmem:[%s787_s3] sm:$0xff]  ;;  %v122_v11 = vld [vmem:[%s787_s3 + $0x8] sm:$0xff]  ;;  %v123_v12 = vld [vmem:[%s787_s3 + $0x10] sm:$0xff]  ;;  %v480_v14 = vpack.c.bf16 %v32_v9, %v31_v8 }
   0x4   :  { %475 = vmatpush3.bf16.msra.mxu0 %v474_v5  ;;  %v124_v13 = vld [vmem:[%s787_s3 + $0x18] sm:$0xff]  ;;  %v498_v15 = vpack.c.bf16 %v122_v11, %v121_v10  ;;  %v33_v16 = vld [vmem:[%s786_s1 + $0x30] sm:$0xff]  ;;  %v125_v19 = vld [vmem:[%s787_s3 + $0x20] sm:$0xff] }
   0x5   :  { %476 = vmatprep.subr.bf16.mxu0 %v554_v0  ;;  %v34_v17 = vld [vmem:[%s786_s1 + $0x38] sm:$0xff]  ;;  %v501_v18 = vpack.c.bf16 %v124_v13, %v123_v12  ;;  %v126_v20 = vld [vmem:[%s787_s3 + $0x28] sm:$0xff]  ;;  %v35_v22 = vld [vmem:[%s786_s1 + $0x40] sm:$0xff] }
   0x6   :  { %499 = vmatpush3.bf16.msra.mxu1 %v498_v15  ;;  %v483_v21 = vpack.c.bf16 %v34_v17, %v33_v16  ;;  %v36_v23 = vld [vmem:[%s786_s1 + $0x48] sm:$0xff]  ;;  %v504_v24 = vpack.c.bf16 %v126_v20, %v125_v19  ;;  %v127_v25 = vld [vmem:[%s787_s3 + $0x30] sm:$0xff]  ;;  %v128_v26 = vld [vmem:[%s787_s3 + $0x38] sm:$0xff] }
   0x7   :  { %500 = vmatprep.subr.bf16.mxu1 %v554_v0  ;;  %v486_v27 = vpack.c.bf16 %v36_v23, %v35_v22  ;;  %v37_v28 = vld [vmem:[%s786_s1 + $0x50] sm:$0xff]  ;;  %v38_v29 = vld [vmem:[%s786_s1 + $0x58] sm:$0xff]  ;;  %v507_v30 = vpack.c.bf16 %v128_v26, %v127_v25  ;;  %v129_v31 = vld [vmem:[%s787_s3 + $0x40] sm:$0xff] }
   0x8   :  { %478 = vmatpush3.bf16.msra.mxu0 %v477_v7  ;;  %v130_v32 = vld [vmem:[%s787_s3 + $0x48] sm:$0xff]  ;;  %v489_v33 = vpack.c.bf16 %v38_v29, %v37_v28  ;;  %v39_v34 = vld [vmem:[%s786_s1 + $0x60] sm:$0xff]  ;;  %v41_v38 = vld [vmem:[%s786_s1 + $0x70] sm:$0xff] }
   0x9   :  { %479 = vmatprep.subr.bf16.mxu0 %v554_v0  ;;  %v40_v35 = vld [vmem:[%s786_s1 + $0x68] sm:$0xff]  ;;  %v510_v36 = vpack.c.bf16 %v130_v32, %v129_v31  ;;  %v42_v39 = vld [vmem:[%s786_s1 + $0x78] sm:$0xff]  ;;  %v26_v41 = vld [vmem:[%s788_s0] sm:$0xff] }
   0xa   :  { %502 = vmatpush3.bf16.msra.mxu1 %v501_v18  ;;  %v492_v37 = vpack.c.bf16 %v40_v35, %v39_v34  ;;  %v495_v40 = vpack.c.bf16 %v42_v39, %v41_v38  ;;  %v131_v42 = vld [vmem:[%s787_s3 + $0x50] sm:$0xff]  ;;  %v132_v43 = vld [vmem:[%s787_s3 + $0x58] sm:$0xff]  ;;  %v133_v45 = vld [vmem:[%s787_s3 + $0x60] sm:$0xff] }
   0xb   :  { %503 = vmatprep.subr.bf16.mxu1 %v554_v0  ;;  %v513_v44 = vpack.c.bf16 %v132_v43, %v131_v42  ;;  %v134_v46 = vld [vmem:[%s787_s3 + $0x68] sm:$0xff]  ;;  %v135_v48 = vld [vmem:[%s787_s3 + $0x70] sm:$0xff]  ;;  %v136_v49 = vld [vmem:[%s787_s3 + $0x78] sm:$0xff] }
   0xc   :  { %481 = vmatpush3.bf16.msra.mxu0 %v480_v14  ;;  %v516_v47 = vpack.c.bf16 %v134_v46, %v133_v45  ;;  %v519_v50 = vpack.c.bf16 %v136_v49, %v135_v48  ;;  %v215_v51 = vld [vmem:[%s789_s5] sm:$0xff]  ;;  %v216_v52 = vld [vmem:[%s789_s5 + $0x8] sm:$0xff]  ;;  %v217_v53 = vld [vmem:[%s789_s5 + $0x10] sm:$0xff] }
   0xd   :  { %482 = vmatprep.subr.bf16.mxu0 %v554_v0  ;;  %v522_v54 = vpack.c.bf16 %v216_v52, %v215_v51  ;;  %v218_v55 = vld [vmem:[%s789_s5 + $0x18] sm:$0xff]  ;;  %v219_v57 = vld [vmem:[%s789_s5 + $0x20] sm:$0xff]  ;;  %v220_v58 = vld [vmem:[%s789_s5 + $0x28] sm:$0xff] }
   0xe   :  { %505 = vmatpush3.bf16.msra.mxu1 %v504_v24  ;;  %v525_v56 = vpack.c.bf16 %v218_v55, %v217_v53  ;;  %v528_v59 = vpack.c.bf16 %v220_v58, %v219_v57  ;;  %v221_v60 = vld [vmem:[%s789_s5 + $0x30] sm:$0xff]  ;;  %v222_v61 = vld [vmem:[%s789_s5 + $0x38] sm:$0xff]  ;;  %v223_v63 = vld [vmem:[%s789_s5 + $0x40] sm:$0xff] }
   0xf   :  { %506 = vmatprep.subr.bf16.mxu1 %v554_v0  ;;  %v531_v62 = vpack.c.bf16 %v222_v61, %v221_v60  ;;  %v224_v1 = vld [vmem:[%s789_s5 + $0x48] sm:$0xff]  ;;  %v314_v3 = vld [vmem:[%s790_s2] ss:$0 sm:$0xff]  ;;  %v225_v8 = vld [vmem:[%s789_s5 + $0x50] sm:$0xff] }
  0x10   :  { %484 = vmatpush3.bf16.msra.mxu0 %v483_v21  ;;  %v534_v2 = vpack.c.bf16 %v224_v1, %v223_v63  ;;  %v226_v9 = vld [vmem:[%s789_s5 + $0x58] sm:$0xff]  ;;  %v227_v11 = vld [vmem:[%s789_s5 + $0x60] sm:$0xff]  ;;  %v228_v12 = vld [vmem:[%s789_s5 + $0x68] sm:$0xff] }
  0x11   :  { %485 = vmatprep.subr.bf16.mxu0 %v554_v0  ;;  %v537_v10 = vpack.c.bf16 %v226_v9, %v225_v8  ;;  %v540_v13 = vpack.c.bf16 %v228_v12, %v227_v11  ;;  %v229_v14 = vld [vmem:[%s789_s5 + $0x70] sm:$0xff]  ;;  %v230_v15 = vld [vmem:[%s789_s5 + $0x78] sm:$0xff]  ;;  %v315_v17 = vld [vmem:[%s791_s4] ss:$0 sm:$0xff] }
  0x12   :  { %508 = vmatpush3.bf16.msra.mxu1 %v507_v30  ;;  %v543_v16 = vpack.c.bf16 %v230_v15, %v229_v14  ;;  %v316_v22 = vld [vmem:[%s792_s6] ss:$0 sm:$0xff] }
  0x13   :  { %509 = vmatprep.subr.bf16.mxu1 %v554_v0 }
  0x14   :  { %487 = vmatpush3.bf16.msra.mxu0 %v486_v27 }
  0x15   :  { %488 = vmatprep.subr.bf16.mxu0 %v554_v0 }
  0x16   :  { %511 = vmatpush3.bf16.msra.mxu1 %v510_v36 }
  0x17   :  { %512 = vmatprep.subr.bf16.mxu1 %v554_v0 }
  0x18   :  { %490 = vmatpush3.bf16.msra.mxu0 %v489_v33 }
  0x19   :  { %491 = vmatprep.subr.bf16.mxu0 %v554_v0 }
  0x1a   :  { %514 = vmatpush3.bf16.msra.mxu1 %v513_v44 }
  0x1b   :  { %515 = vmatprep.subr.bf16.mxu1 %v554_v0 }
  0x1c   :  { %493 = vmatpush3.bf16.msra.mxu0 %v492_v37 }
  0x1d   :  { %494 = vmatprep.subr.bf16.mxu0 %v554_v0 }
  0x1e   :  { %517 = vmatpush3.bf16.msra.mxu1 %v516_v47 }
  0x1f   :  { %518 = vmatprep.subr.bf16.mxu1 %v554_v0 }
  0x20   :  { %496 = vmatpush3.bf16.msra.mxu0 %v495_v40 }
  0x21   :  { %521 = vmatprep.subr.bf16.mxu0 %v554_v0 }
  0x22   :  { %520 = vmatpush3.bf16.msra.mxu1 %v519_v50 }
  0x23   :  { %401 = vmatmul.mubr.f32.vlgmr.msra.gmra.mrb[0].mxu0 %v26_v41 }
  0x24   :  { %470 = vmatprep.mubr.msk.f32.mxu0 %vm555_vm0, %v556_v4  ;;  %523 = vmatpush3.bf16.msra.mxu0 %v522_v54 }
  0x25   :  { %524 = vmatprep.subr.bf16.mxu0 %v554_v0 }
  0x28   :  { %526 = vmatpush3.bf16.msra.mxu0 %v525_v56 }
  0x29   :  { %527 = vmatprep.subr.bf16.mxu0 %v554_v0 }
  0x2c   :  { %529 = vmatpush3.bf16.msra.mxu0 %v528_v59 }
  0x2d   :  { %530 = vmatprep.subr.bf16.mxu0 %v554_v0 }
  0x30   :  { %532 = vmatpush3.bf16.msra.mxu0 %v531_v62 }
  0x31   :  { %533 = vmatprep.subr.bf16.mxu0 %v554_v0 }
  0x34   :  { %535 = vmatpush3.bf16.msra.mxu0 %v534_v2 }
  0x35   :  { %536 = vmatprep.subr.bf16.mxu0 %v554_v0 }
  0x38   :  { %538 = vmatpush3.bf16.msra.mxu0 %v537_v10 }
  0x39   :  { %539 = vmatprep.subr.bf16.mxu0 %v554_v0 }
  0x3c   :  { %541 = vmatpush3.bf16.msra.mxu0 %v540_v13 }
  0x3d   :  { %542 = vmatprep.subr.bf16.mxu0 %v554_v0 }
  0x40   :  { %544 = vmatpush3.bf16.msra.mxu0 %v543_v16 }
  0xf6   :  { %v116_v4 = vpop.f32.mrb[0].mxu0 }
  0xf7   :  { %v117_v5 = vadd.f32 %v314_v3, %v116_v4  ;;  %v402_v6 = vpop.f32.mrb[1].mxu0 }
  0xf9   :  { %548 = vtanh.f32 %v117_v5 }
 0x103   :  { %v549_v7 = vpop.eup %548 }
 0x104   :  { %436 = vmatmul.mubr.f32.vlgmr.msra.gmra.mrb[0].mxu1 %v549_v7 }
 0x1d7   :  { %v210_v18 = vpop.f32.mrb[0].mxu1 }
 0x1d8   :  { %v211_v19 = vadd.f32 %v315_v17, %v210_v18  ;;  %v437_v20 = vpop.f32.mrb[1].mxu1 }
 0x1da   :  { %550 = vtanh.f32 %v211_v19 }
 0x1e4   :  { %v551_v21 = vpop.eup %550 }
 0x1e5   :  { %471 = vmatmul.mubr.f32.vlgmr.msra.gmra.mrb[2].mxu0 %v551_v21 }
 0x2b8   :  { %v304_v23 = vpop.f32.mrb[2].mxu0 }
 0x2b9   :  { %v305_v24 = vadd.f32 %v316_v22, %v304_v23  ;;  %v472_v25 = vpop.f32.mrb[3].mxu0 }
 0x2bb   :  { %552 = vtanh.f32 %v305_v24 }
 0x2c5   :  { %v553_v0 = vpop.eup %552 }
 0x2c6   :  { %309 = vst [vmem:[%s793_s7] sm:$0xff] %v553_v0 }

</bundles_post_ra>
